<compile_context>
chip_gen: v6e
topology: v6e:2x2x1
jax: 0.10.0
libtpu: 0.0.40
codegen_flags: <defaults>
</compile_context>

<pallas_src>
import functools

import jax
import jax.numpy as jnp
from jax import lax
from jax.experimental import pallas as pl
from jax.experimental.pallas import tpu as pltpu


def _round_up(x, m):
    return (x + m - 1) // m * m


def _group_norm_kernel(x_ref, w_ref, b_ref, seg_ref, o_ref, *, inv_cg, eps, exact):
    # x_ref:   (TN, Cp)  lane-dense input tile
    # w_ref:   (1,  Cp)  per-channel scale (f32)
    # b_ref:   (1,  Cp)  per-channel shift (f32)
    # seg_ref: (Cp, Gp)  one-hot channel->group membership, bf16 {0, 1}
    f32 = jnp.float32
    bf16 = jnp.bfloat16

    x = x_ref[...].astype(f32)                       # (TN, Cp)
    seg = seg_ref[...]                               # (Cp, Gp)

    reduce_dn = (((1,), (0,)), ((), ()))             # (TN,Cp) x (Cp,Gp) -> (TN,Gp)
    bcast_dn = (((1,), (1,)), ((), ()))              # (TN,Gp) x (Cp,Gp) -> (TN,Cp)

    def seg_matmul(a, dn):
        # seg is exactly {0,1}: every bf16 product is exact and the MXU
        # accumulates in f32, so one bf16 pass only loses the bf16 rounding of
        # `a`.  With exact=True a second pass over the bf16 remainder restores
        # ~f32 accuracy -- 2 bf16 passes, still far cheaper than an emulated
        # f32 MXU matmul (and keeps the kernel memory-bound).
        a_hi = a.astype(bf16)
        out = lax.dot_general(a_hi, seg, dn, preferred_element_type=f32)
        if exact:
            a_lo = (a - a_hi.astype(f32)).astype(bf16)
            out = out + lax.dot_general(a_lo, seg, dn, preferred_element_type=f32)
        return out

    # Pass 1: per-(row, group) mean via MXU segment reduction + broadcast-back.
    mean = seg_matmul(x, reduce_dn) * inv_cg          # (TN, Gp)
    mean_c = seg_matmul(mean, bcast_dn)               # (TN, Cp)

    # Pass 2: centered second moment -> inv_std (two-pass variance, f32 VPU).
    centered = x - mean_c
    var = seg_matmul(centered * centered, reduce_dn) * inv_cg     # (TN, Gp)
    inv_std_c = seg_matmul(lax.rsqrt(var + eps), bcast_dn)        # (TN, Cp)

    # Fused per-channel affine epilogue.
    o_ref[...] = (centered * (inv_std_c * w_ref[...]) + b_ref[...]).astype(o_ref.dtype)


def group_norm_1d(x, weight, bias, *, num_groups=32, min_channels_per_group=4,
                  eps=1e-5, block_n=None, exact_stats=True):
    """Pallas TPU GroupNorm1d forward. x: (N, C); weight, bias: (C,)."""
    n, c = x.shape
    # Matches cleandiffuser: the *effective* group count is capped by dim.
    g = min(num_groups, c // min_channels_per_group)
    assert g >= 1 and c % g == 0, "channels must be divisible by the group count"
    cg = c // g
    out_dtype = x.dtype

    # Lane-dense padding: channels (and group/stat columns) to multiples of 128.
    c_pad = _round_up(c, 128)
    g_pad = _round_up(g, 128)

    # ---- generation-aware VMEM sizing (v7x: 64 MiB, v5e/v6e: 128 MiB) ------
    try:
        vmem_cap = int(pltpu.get_tpu_info().vmem_capacity_bytes)
    except Exception:  # unknown part -> assume the small (v7x-sized) VMEM
        vmem_cap = 64 << 20
    vmem_limit = max(min(vmem_cap * 7 // 8, 96 << 20), 32 << 20)

    in_sz = jnp.dtype(x.dtype).itemsize
    out_sz = jnp.dtype(out_dtype).itemsize
    # Constants resident in VMEM (seg bf16 + w/b f32); budget for 2 buffers
    # even though we request single-buffering below.
    const_bytes = c_pad * g_pad * 2 + 2 * c_pad * 4
    # Double-buffered in/out tiles plus ~8 live f32/bf16 temporaries per row.
    per_row = c_pad * (2 * in_sz + 2 * out_sz + 8 * 4)
    tile_budget = max(vmem_limit - 2 * const_bytes - (4 << 20), per_row * 8)

    row_align = {4: 8, 2: 16, 1: 32}.get(in_sz, 8)
    if block_n is None:
        bn_budget = max(row_align,
                        min(1024, (tile_budget // per_row) // row_align * row_align))
        # Target >= 8 grid steps (and >= 2 whenever N allows) so both v7x
        # TensorCores stay fed and per-step overhead is amortized.
        bn_target = max(row_align, _round_up(pl.cdiv(n, 8), row_align))
        block_n = min(bn_budget, bn_target)
    else:
        block_n = max(row_align, _round_up(block_n, row_align))

    n_pad = _round_up(n, block_n)
    grid_steps = n_pad // block_n

    # Pad operands (zeros; padded rows/channels are sliced off at the end).
    xp = x if (n_pad, c_pad) == (n, c) else jnp.pad(
        x, ((0, n_pad - n), (0, c_pad - c)))
    wp = jnp.pad(weight.astype(jnp.float32), (0, c_pad - c)).reshape(1, c_pad)
    bp = jnp.pad(bias.astype(jnp.float32), (0, c_pad - c)).reshape(1, c_pad)

    # One-hot channel->group membership ({0,1} is exact in bf16).  Padded
    # channels belong to no group so their stats and outputs stay zero.
    ch = jnp.arange(c_pad)
    gid = jnp.where(ch < c, ch // cg, g_pad)
    seg = (gid[:, None] == jnp.arange(g_pad)[None, :]).astype(jnp.bfloat16)

    kernel = functools.partial(_group_norm_kernel, inv_cg=1.0 / cg, eps=eps,
                               exact=exact_stats)

    mxu_passes = 8 if exact_stats else 4
    cost = pl.CostEstimate(
        flops=2 * mxu_passes * n_pad * c_pad * g_pad + 8 * n_pad * c_pad,
        transcendentals=n_pad * g_pad,
        bytes_accessed=n_pad * c_pad * (in_sz + out_sz) + const_bytes,
    )
    cparams = pltpu.CompilerParams(
        dimension_semantics=("parallel",),
        vmem_limit_bytes=int(vmem_limit),
    )

    def build(const_pipeline_mode):
        def const_spec(shape):
            kwargs = ({} if const_pipeline_mode is None
                      else dict(pipeline_mode=const_pipeline_mode))
            return pl.BlockSpec(shape, lambda i: (0, 0), **kwargs)

        return pl.pallas_call(
            kernel,
            out_shape=jax.ShapeDtypeStruct((n_pad, c_pad), out_dtype),
            grid_spec=pltpu.PrefetchScalarGridSpec(
                num_scalar_prefetch=0,
                grid=(grid_steps,),
                in_specs=[
                    pl.BlockSpec((block_n, c_pad), lambda i: (i, 0)),
                    const_spec((1, c_pad)),
                    const_spec((1, c_pad)),
                    const_spec((c_pad, g_pad)),
                ],
                out_specs=pl.BlockSpec((block_n, c_pad), lambda i: (i, 0)),
            ),
            compiler_params=cparams,
            cost_estimate=cost,
        )

    try:
        # Constant blocks never change across grid steps; single-buffer them.
        out_padded = build(pl.Buffered(1))(xp, wp, bp, seg)
    except Exception:
        # Fallback for jax versions where pallas_call BlockSpecs reject
        # pipeline_mode; costs at most one extra buffer per constant input.
        out_padded = build(None)(xp, wp, bp, seg)

    if (n_pad, c_pad) != (n, c):
        out_padded = out_padded[:n, :c]
    return out_padded


def _group_norm_ref(x, weight, bias, *, num_groups, eps):
    n, c = x.shape
    xg = x.reshape(n, num_groups, c // num_groups)
    mean = jnp.mean(xg, axis=-1, keepdims=True)
    var = jnp.mean((xg - mean) ** 2, axis=-1, keepdims=True)
    xn = ((xg - mean) / jnp.sqrt(var + eps)).reshape(n, c)
    return xn * weight[None, :] + bias[None, :]


if __name__ == "__main__":
    batch, dim = 16, 32          # dim=32 -> num_groups = min(32, 32 // 4) = 8
    eps = 1e-5

    key = jax.random.PRNGKey(0)
    kx, kw, kb = jax.random.split(key, 3)
    x = jax.random.normal(kx, (batch, dim), dtype=jnp.float32)
    # Module init is ones/zeros; perturb deterministically so the affine path
    # is actually exercised.
    weight = 1.0 + 0.1 * jax.random.normal(kw, (dim,), dtype=jnp.float32)
    bias = 0.1 * jax.random.normal(kb, (dim,), dtype=jnp.float32)

    g = min(32, dim // 4)
    ref = _group_norm_ref(x, weight, bias, num_groups=g, eps=eps)

    # Default path: exact (hi+lo bf16) segment matmuls -> ~f32 accuracy.
    out = jax.block_until_ready(
        group_norm_1d(x, weight, bias, num_groups=32, min_channels_per_group=4,
                      eps=eps))
    assert out.shape == (batch, dim)
    assert jnp.allclose(out, ref, atol=1e-4, rtol=1e-4), \
        float(jnp.max(jnp.abs(out - ref)))

    # Fast path: single bf16 pass per segment matmul (bf16-level accuracy,
    # tolerance loosened accordingly).
    out_fast = jax.block_until_ready(
        group_norm_1d(x, weight, bias, num_groups=32, min_channels_per_group=4,
                      eps=eps, exact_stats=False))
    assert jnp.allclose(out_fast, ref, atol=3e-2, rtol=3e-2), \
        float(jnp.max(jnp.abs(out_fast - ref)))

    print("KERNEL_OK")
</pallas_src>

<mosaic_0001>
module attributes {stable_mosaic.version = 11 : i64} {
  func.func @_group_norm_kernel(%arg0: i32, %arg1: memref<8x128xf32, #tpu.memory_space<vmem>>, %arg2: memref<1x128xf32, #tpu.memory_space<vmem>>, %arg3: memref<1x128xf32, #tpu.memory_space<vmem>>, %arg4: memref<128x128xbf16, #tpu.memory_space<vmem>>, %arg5: memref<8x128xf32, #tpu.memory_space<vmem>>) attributes {dimension_semantics = [#tpu.dimension_semantics<parallel>], iteration_bounds = array<i64: 2>, scalar_prefetch = 0 : i64, scratch_operands = 0 : i64, tpu.core_type = #tpu.core_type<tc>, window_params = [{transform_indices = @transform_0, window_bounds = array<i64: 8, 128>}, {pipeline_mode = #tpu.pipeline_mode<synchronous>, transform_indices = @transform_1, window_bounds = array<i64: 1, 128>}, {pipeline_mode = #tpu.pipeline_mode<synchronous>, transform_indices = @transform_2, window_bounds = array<i64: 1, 128>}, {pipeline_mode = #tpu.pipeline_mode<synchronous>, transform_indices = @transform_3, window_bounds = array<i64: 128, 128>}, {transform_indices = @transform_4, window_bounds = array<i64: 8, 128>}]} {
    %c0 = arith.constant 0 : index
    %c0_0 = arith.constant 0 : index
    %0 = vector.load %arg1[%c0, %c0_0] : memref<8x128xf32, #tpu.memory_space<vmem>>, vector<8x128xf32>
    %c0_1 = arith.constant 0 : index
    %c0_2 = arith.constant 0 : index
    %1 = vector.load %arg4[%c0_1, %c0_2] : memref<128x128xbf16, #tpu.memory_space<vmem>>, vector<128x128xbf16>
    %2 = arith.truncf %0 : vector<8x128xf32> to vector<8x128xbf16>
    %cst = arith.constant dense<0.000000e+00> : vector<8x128xf32>
    %3 = tpu.matmul %2, %1, %cst {dimension_numbers = #tpu.dot_dimension_numbers<[1], [0], [0], [1], [0, 0, 1, 1], [], []>} : vector<8x128xbf16>, vector<128x128xbf16>, vector<8x128xf32> -> vector<8x128xf32>
    %4 = arith.extf %2 : vector<8x128xbf16> to vector<8x128xf32>
    %5 = arith.subf %0, %4 : vector<8x128xf32>
    %6 = arith.truncf %5 : vector<8x128xf32> to vector<8x128xbf16>
    %cst_3 = arith.constant dense<0.000000e+00> : vector<8x128xf32>
    %7 = tpu.matmul %6, %1, %cst_3 {dimension_numbers = #tpu.dot_dimension_numbers<[1], [0], [0], [1], [0, 0, 1, 1], [], []>} : vector<8x128xbf16>, vector<128x128xbf16>, vector<8x128xf32> -> vector<8x128xf32>
    %8 = arith.addf %3, %7 : vector<8x128xf32>
    %cst_4 = arith.constant 2.500000e-01 : f32
    %9 = vector.broadcast %cst_4 : f32 to vector<8x128xf32>
    %10 = arith.mulf %8, %9 : vector<8x128xf32>
    %11 = arith.truncf %10 : vector<8x128xf32> to vector<8x128xbf16>
    %cst_5 = arith.constant dense<0.000000e+00> : vector<8x128xf32>
    %12 = tpu.matmul %11, %1, %cst_5 {dimension_numbers = #tpu.dot_dimension_numbers<[1], [1], [0], [0], [0, 0, 1, 0], [], []>} : vector<8x128xbf16>, vector<128x128xbf16>, vector<8x128xf32> -> vector<8x128xf32>
    %13 = arith.extf %11 : vector<8x128xbf16> to vector<8x128xf32>
    %14 = arith.subf %10, %13 : vector<8x128xf32>
    %15 = arith.truncf %14 : vector<8x128xf32> to vector<8x128xbf16>
    %cst_6 = arith.constant dense<0.000000e+00> : vector<8x128xf32>
    %16 = tpu.matmul %15, %1, %cst_6 {dimension_numbers = #tpu.dot_dimension_numbers<[1], [1], [0], [0], [0, 0, 1, 0], [], []>} : vector<8x128xbf16>, vector<128x128xbf16>, vector<8x128xf32> -> vector<8x128xf32>
    %17 = arith.addf %12, %16 : vector<8x128xf32>
    %18 = arith.subf %0, %17 : vector<8x128xf32>
    %19 = arith.mulf %18, %18 : vector<8x128xf32>
    %20 = arith.truncf %19 : vector<8x128xf32> to vector<8x128xbf16>
    %cst_7 = arith.constant dense<0.000000e+00> : vector<8x128xf32>
    %21 = tpu.matmul %20, %1, %cst_7 {dimension_numbers = #tpu.dot_dimension_numbers<[1], [0], [0], [1], [0, 0, 1, 1], [], []>} : vector<8x128xbf16>, vector<128x128xbf16>, vector<8x128xf32> -> vector<8x128xf32>
    %22 = arith.extf %20 : vector<8x128xbf16> to vector<8x128xf32>
    %23 = arith.subf %19, %22 : vector<8x128xf32>
    %24 = arith.truncf %23 : vector<8x128xf32> to vector<8x128xbf16>
    %cst_8 = arith.constant dense<0.000000e+00> : vector<8x128xf32>
    %25 = tpu.matmul %24, %1, %cst_8 {dimension_numbers = #tpu.dot_dimension_numbers<[1], [0], [0], [1], [0, 0, 1, 1], [], []>} : vector<8x128xbf16>, vector<128x128xbf16>, vector<8x128xf32> -> vector<8x128xf32>
    %26 = arith.addf %21, %25 : vector<8x128xf32>
    %cst_9 = arith.constant 2.500000e-01 : f32
    %27 = vector.broadcast %cst_9 : f32 to vector<8x128xf32>
    %28 = arith.mulf %26, %27 : vector<8x128xf32>
    %cst_10 = arith.constant 9.99999974E-6 : f32
    %29 = vector.broadcast %cst_10 : f32 to vector<8x128xf32>
    %30 = arith.addf %28, %29 : vector<8x128xf32>
    %31 = math.rsqrt %30 : vector<8x128xf32>
    %32 = arith.truncf %31 : vector<8x128xf32> to vector<8x128xbf16>
    %cst_11 = arith.constant dense<0.000000e+00> : vector<8x128xf32>
    %33 = tpu.matmul %32, %1, %cst_11 {dimension_numbers = #tpu.dot_dimension_numbers<[1], [1], [0], [0], [0, 0, 1, 0], [], []>} : vector<8x128xbf16>, vector<128x128xbf16>, vector<8x128xf32> -> vector<8x128xf32>
    %34 = arith.extf %32 : vector<8x128xbf16> to vector<8x128xf32>
    %35 = arith.subf %31, %34 : vector<8x128xf32>
    %36 = arith.truncf %35 : vector<8x128xf32> to vector<8x128xbf16>
    %cst_12 = arith.constant dense<0.000000e+00> : vector<8x128xf32>
    %37 = tpu.matmul %36, %1, %cst_12 {dimension_numbers = #tpu.dot_dimension_numbers<[1], [1], [0], [0], [0, 0, 1, 0], [], []>} : vector<8x128xbf16>, vector<128x128xbf16>, vector<8x128xf32> -> vector<8x128xf32>
    %38 = arith.addf %33, %37 : vector<8x128xf32>
    %c0_13 = arith.constant 0 : index
    %c0_14 = arith.constant 0 : index
    %39 = vector.load %arg2[%c0_13, %c0_14] : memref<1x128xf32, #tpu.memory_space<vmem>>, vector<1x128xf32>
    %40 = vector.broadcast %39 : vector<1x128xf32> to vector<8x128xf32>
    %41 = arith.mulf %38, %40 : vector<8x128xf32>
    %42 = arith.mulf %18, %41 : vector<8x128xf32>
    %c0_15 = arith.constant 0 : index
    %c0_16 = arith.constant 0 : index
    %43 = vector.load %arg3[%c0_15, %c0_16] : memref<1x128xf32, #tpu.memory_space<vmem>>, vector<1x128xf32>
    %44 = vector.broadcast %43 : vector<1x128xf32> to vector<8x128xf32>
    %45 = arith.addf %42, %44 : vector<8x128xf32>
    %c0_17 = arith.constant 0 : index
    %c0_18 = arith.constant 0 : index
    %46 = vector.load %arg5[%c0_17, %c0_18] : memref<8x128xf32, #tpu.memory_space<vmem>>, vector<8x128xf32>
    tpu.vector_store %arg5[%c0_17, %c0_18], %45 {strides = array<i32>} : memref<8x128xf32, #tpu.memory_space<vmem>>, vector<8x128xf32>,
    return
  }
  func.func @transform_0(%arg0: i32) -> (i32, i32) {
    %c0_i32 = arith.constant 0 : i32
    %c0_i32_0 = arith.constant 0 : i32
    return %arg0, %c0_i32 : i32, i32
  }
  func.func @transform_1(%arg0: i32) -> (i32, i32) {
    %c0_i32 = arith.constant 0 : i32
    %c0_i32_0 = arith.constant 0 : i32
    %c0_i32_1 = arith.constant 0 : i32
    return %c0_i32, %c0_i32_0 : i32, i32
  }
  func.func @transform_2(%arg0: i32) -> (i32, i32) {
    %c0_i32 = arith.constant 0 : i32
    %c0_i32_0 = arith.constant 0 : i32
    %c0_i32_1 = arith.constant 0 : i32
    return %c0_i32, %c0_i32_0 : i32, i32
  }
  func.func @transform_3(%arg0: i32) -> (i32, i32) {
    %c0_i32 = arith.constant 0 : i32
    %c0_i32_0 = arith.constant 0 : i32
    %c0_i32_1 = arith.constant 0 : i32
    return %c0_i32, %c0_i32_0 : i32, i32
  }
  func.func @transform_4(%arg0: i32) -> (i32, i32) {
    %c0_i32 = arith.constant 0 : i32
    %c0_i32_0 = arith.constant 0 : i32
    return %arg0, %c0_i32 : i32, i32
  }
}

module attributes {stable_mosaic.version = 11 : i64} {
  func.func @_group_norm_kernel(%arg0: i32, %arg1: memref<8x128xf32, #tpu.memory_space<vmem>>, %arg2: memref<1x128xf32, #tpu.memory_space<vmem>>, %arg3: memref<1x128xf32, #tpu.memory_space<vmem>>, %arg4: memref<128x128xbf16, #tpu.memory_space<vmem>>, %arg5: memref<8x128xf32, #tpu.memory_space<vmem>>) attributes {dimension_semantics = [#tpu.dimension_semantics<parallel>], iteration_bounds = array<i64: 2>, scalar_prefetch = 0 : i64, scratch_operands = 0 : i64, tpu.core_type = #tpu.core_type<tc>, window_params = [{transform_indices = @transform_0, window_bounds = array<i64: 8, 128>}, {pipeline_mode = #tpu.pipeline_mode<synchronous>, transform_indices = @transform_1, window_bounds = array<i64: 1, 128>}, {pipeline_mode = #tpu.pipeline_mode<synchronous>, transform_indices = @transform_2, window_bounds = array<i64: 1, 128>}, {pipeline_mode = #tpu.pipeline_mode<synchronous>, transform_indices = @transform_3, window_bounds = array<i64: 128, 128>}, {transform_indices = @transform_4, window_bounds = array<i64: 8, 128>}]} {
    %c0 = arith.constant 0 : index
    %c0_0 = arith.constant 0 : index
    %0 = vector.load %arg1[%c0, %c0_0] : memref<8x128xf32, #tpu.memory_space<vmem>>, vector<8x128xf32>
    %c0_1 = arith.constant 0 : index
    %c0_2 = arith.constant 0 : index
    %1 = vector.load %arg4[%c0_1, %c0_2] : memref<128x128xbf16, #tpu.memory_space<vmem>>, vector<128x128xbf16>
    %2 = arith.truncf %0 : vector<8x128xf32> to vector<8x128xbf16>
    %cst = arith.constant dense<0.000000e+00> : vector<8x128xf32>
    %3 = tpu.matmul %2, %1, %cst {dimension_numbers = #tpu.dot_dimension_numbers<[1], [0], [0], [1], [0, 0, 1, 1], [], []>} : vector<8x128xbf16>, vector<128x128xbf16>, vector<8x128xf32> -> vector<8x128xf32>
    %4 = arith.extf %2 : vector<8x128xbf16> to vector<8x128xf32>
    %5 = arith.subf %0, %4 : vector<8x128xf32>
    %6 = arith.truncf %5 : vector<8x128xf32> to vector<8x128xbf16>
    %cst_3 = arith.constant dense<0.000000e+00> : vector<8x128xf32>
    %7 = tpu.matmul %6, %1, %cst_3 {dimension_numbers = #tpu.dot_dimension_numbers<[1], [0], [0], [1], [0, 0, 1, 1], [], []>} : vector<8x128xbf16>, vector<128x128xbf16>, vector<8x128xf32> -> vector<8x128xf32>
    %8 = arith.addf %3, %7 : vector<8x128xf32>
    %cst_4 = arith.constant 2.500000e-01 : f32
    %9 = vector.broadcast %cst_4 : f32 to vector<8x128xf32>
    %10 = arith.mulf %8, %9 : vector<8x128xf32>
    %11 = arith.truncf %10 : vector<8x128xf32> to vector<8x128xbf16>
    %cst_5 = arith.constant dense<0.000000e+00> : vector<8x128xf32>
    %12 = tpu.matmul %11, %1, %cst_5 {dimension_numbers = #tpu.dot_dimension_numbers<[1], [1], [0], [0], [0, 0, 1, 0], [], []>} : vector<8x128xbf16>, vector<128x128xbf16>, vector<8x128xf32> -> vector<8x128xf32>
    %13 = arith.extf %11 : vector<8x128xbf16> to vector<8x128xf32>
    %14 = arith.subf %10, %13 : vector<8x128xf32>
    %15 = arith.truncf %14 : vector<8x128xf32> to vector<8x128xbf16>
    %cst_6 = arith.constant dense<0.000000e+00> : vector<8x128xf32>
    %16 = tpu.matmul %15, %1, %cst_6 {dimension_numbers = #tpu.dot_dimension_numbers<[1], [1], [0], [0], [0, 0, 1, 0], [], []>} : vector<8x128xbf16>, vector<128x128xbf16>, vector<8x128xf32> -> vector<8x128xf32>
    %17 = arith.addf %12, %16 : vector<8x128xf32>
    %18 = arith.subf %0, %17 : vector<8x128xf32>
    %19 = arith.mulf %18, %18 : vector<8x128xf32>
    %20 = arith.truncf %19 : vector<8x128xf32> to vector<8x128xbf16>
    %cst_7 = arith.constant dense<0.000000e+00> : vector<8x128xf32>
    %21 = tpu.matmul %20, %1, %cst_7 {dimension_numbers = #tpu.dot_dimension_numbers<[1], [0], [0], [1], [0, 0, 1, 1], [], []>} : vector<8x128xbf16>, vector<128x128xbf16>, vector<8x128xf32> -> vector<8x128xf32>
    %22 = arith.extf %20 : vector<8x128xbf16> to vector<8x128xf32>
    %23 = arith.subf %19, %22 : vector<8x128xf32>
    %24 = arith.truncf %23 : vector<8x128xf32> to vector<8x128xbf16>
    %cst_8 = arith.constant dense<0.000000e+00> : vector<8x128xf32>
    %25 = tpu.matmul %24, %1, %cst_8 {dimension_numbers = #tpu.dot_dimension_numbers<[1], [0], [0], [1], [0, 0, 1, 1], [], []>} : vector<8x128xbf16>, vector<128x128xbf16>, vector<8x128xf32> -> vector<8x128xf32>
    %26 = arith.addf %21, %25 : vector<8x128xf32>
    %cst_9 = arith.constant 2.500000e-01 : f32
    %27 = vector.broadcast %cst_9 : f32 to vector<8x128xf32>
    %28 = arith.mulf %26, %27 : vector<8x128xf32>
    %cst_10 = arith.constant 9.99999974E-6 : f32
    %29 = vector.broadcast %cst_10 : f32 to vector<8x128xf32>
    %30 = arith.addf %28, %29 : vector<8x128xf32>
    %31 = math.rsqrt %30 : vector<8x128xf32>
    %32 = arith.truncf %31 : vector<8x128xf32> to vector<8x128xbf16>
    %cst_11 = arith.constant dense<0.000000e+00> : vector<8x128xf32>
    %33 = tpu.matmul %32, %1, %cst_11 {dimension_numbers = #tpu.dot_dimension_numbers<[1], [1], [0], [0], [0, 0, 1, 0], [], []>} : vector<8x128xbf16>, vector<128x128xbf16>, vector<8x128xf32> -> vector<8x128xf32>
    %34 = arith.extf %32 : vector<8x128xbf16> to vector<8x128xf32>
    %35 = arith.subf %31, %34 : vector<8x128xf32>
    %36 = arith.truncf %35 : vector<8x128xf32> to vector<8x128xbf16>
    %cst_12 = arith.constant dense<0.000000e+00> : vector<8x128xf32>
    %37 = tpu.matmul %36, %1, %cst_12 {dimension_numbers = #tpu.dot_dimension_numbers<[1], [1], [0], [0], [0, 0, 1, 0], [], []>} : vector<8x128xbf16>, vector<128x128xbf16>, vector<8x128xf32> -> vector<8x128xf32>
    %38 = arith.addf %33, %37 : vector<8x128xf32>
    %c0_13 = arith.constant 0 : index
    %c0_14 = arith.constant 0 : index
    %39 = vector.load %arg2[%c0_13, %c0_14] : memref<1x128xf32, #tpu.memory_space<vmem>>, vector<1x128xf32>
    %40 = vector.broadcast %39 : vector<1x128xf32> to vector<8x128xf32>
    %41 = arith.mulf %38, %40 : vector<8x128xf32>
    %42 = arith.mulf %18, %41 : vector<8x128xf32>
    %c0_15 = arith.constant 0 : index
    %c0_16 = arith.constant 0 : index
    %43 = vector.load %arg3[%c0_15, %c0_16] : memref<1x128xf32, #tpu.memory_space<vmem>>, vector<1x128xf32>
    %44 = vector.broadcast %43 : vector<1x128xf32> to vector<8x128xf32>
    %45 = arith.addf %42, %44 : vector<8x128xf32>
    %c0_17 = arith.constant 0 : index
    %c0_18 = arith.constant 0 : index
    %46 = vector.load %arg5[%c0_17, %c0_18] : memref<8x128xf32, #tpu.memory_space<vmem>>, vector<8x128xf32>
    tpu.vector_store %arg5[%c0_17, %c0_18], %45 {strides = array<i32>} : memref<8x128xf32, #tpu.memory_space<vmem>>, vector<8x128xf32>,
    return
  }
  func.func @transform_0(%arg0: i32) -> (i32, i32) {
    %c0_i32 = arith.constant 0 : i32
    %c0_i32_0 = arith.constant 0 : i32
    return %arg0, %c0_i32 : i32, i32
  }
  func.func @transform_1(%arg0: i32) -> (i32, i32) {
    %c0_i32 = arith.constant 0 : i32
    %c0_i32_0 = arith.constant 0 : i32
    %c0_i32_1 = arith.constant 0 : i32
    return %c0_i32, %c0_i32_0 : i32, i32
  }
  func.func @transform_2(%arg0: i32) -> (i32, i32) {
    %c0_i32 = arith.constant 0 : i32
    %c0_i32_0 = arith.constant 0 : i32
    %c0_i32_1 = arith.constant 0 : i32
    return %c0_i32, %c0_i32_0 : i32, i32
  }
  func.func @transform_3(%arg0: i32) -> (i32, i32) {
    %c0_i32 = arith.constant 0 : i32
    %c0_i32_0 = arith.constant 0 : i32
    %c0_i32_1 = arith.constant 0 : i32
    return %c0_i32, %c0_i32_0 : i32, i32
  }
  func.func @transform_4(%arg0: i32) -> (i32, i32) {
    %c0_i32 = arith.constant 0 : i32
    %c0_i32_0 = arith.constant 0 : i32
    return %arg0, %c0_i32 : i32, i32
  }
}

</mosaic_0001>

<bundles_post_ra>
// kernel: tpu_custom_call.1
= control target key start
LH: loop header
LB: loop body
LE: loop exit
PB: predicated region body
PF: predicated region fallthrough
CT: control target
= control target key end

     0   :  { %9 = vsyncpa [#allocation3], 0  ;;  %s1566_s0 = inlined_call_operand.hbm [shape: f32[16,128], index: 0, kind: input, shape index: {}]   ;;  %s1567_s1 = inlined_call_operand.vmem [shape: f32[1,128], index: 1, kind: input, shape index: {}]   ;;  %s1568_s2 = inlined_call_operand.vmem [shape: f32[1,128], index: 2, kind: input, shape index: {}]   ;;  %s1569_s3 = inlined_call_operand.hbm [shape: bf16[128,128], index: 3, kind: input, shape index: {}]   ;;  %s1570_s4 = inlined_call_operand.hbm [shape: f32[16,128], index: 4, kind: output, shape index: {}]  }
   0x1   :  { %11 = vsyncpa [#allocation3 + $0x1], 0 }
   0x2   :  { %12 = vsyncpa [#allocation6], 0 }
   0x3   :  { %13 = vsyncpa [#allocation4], 0 }
   0x4   :  { %15 = vsyncpa [#allocation4 + $0x1], 0  ;;  %s1231_s15 = smov 0   ;;  %s1233_s16 = smov 0  }
   0x5   :  { %s1235_s17 = smov 0   ;;  %s1237_s18 = smov 0  }
   0x6 LB: > { %s1252_s19 = sadd.s32 4294967295, %s1197_s18   ;;  %s748_s20 = sadd.s32 4294967294, %s1197_s18   ;;  %s1197_s18 = sphi %s1237_s18, %s1592_s18   ;;  %s1193_s17 = sphi %s1235_s17, %s1591_s17   ;;  %s1189_s16 = sphi %s1233_s16, %s1590_s16   ;;  %s1185_s15 = sphi %s1231_s15, %s1589_s15  }
   0x7   : > { %p41_p0 = scmp.ne.s32.totalorder %s1189_s16, %s1185_s15  ;;  %p1571_p1 = scmp.eq.s32.totalorder %s1252_s19, 0 }
   0x8   : > { %p134_p3 = scmp.eq.s32.totalorder %s748_s20, 1  ;;  %p749_p5 = scmp.ge.s32.totalorder %s1197_s18, 1 }
   0x9   : > { %p1261_p4 = por %p1571_p1, %p41_p0  ;;  %p141_p7 = scmp.lt.s32.totalorder %s1197_s18, 3 }
   0xa   : > { %p1266_p6 = por %p134_p3, %p41_p0  ;;  %s1199_s24 = smov [#allocation5]  }
   0xb   : > { %s1575_s21 = scalar_select %p1261_p4, 1, 0 }
   0xc   : > { %s1576_s22 = scalar_select %p1266_p6, 1, 0 }
   0xd   : > { %p1271_p8 = pnand %p749_p5, %p141_p7  ;;  %s159_s25 = sshll.u32 %s1199_s24, 4  ;;  %s160_s25 = int_to_ptr.vmem [resolvable:$true] %s159_s25 }
   0xe   : > { %s1285_s27 = sadd.s32 1, %s1197_s18   ;;  %s28_s28 = sadd.s32 1, %s1193_s17 }
   0xf   : > { %s1577_s23 = scalar_select %p1271_p8, 1, 0 }
  0x10   : > { %p1012_p9 = pneg %p1271_p8  ;;  %s25_s29 = ssub.s32 %s1197_s18, %s1285_s27 }
  0x11   : > { %s1086_s30 = scalar_lea.vmem %s160_s25, 1024  ;;  %p1094_p5 = scmp.lt.s32.totalorder %s160_s25, %s160_s25 }
  0x12   : > { %p1280_p11 = pnand %p1012_p9, %p1571_p1  ;;  %p1087_p13 = scmp.ne.s32.totalorder %s160_s25, %s1086_s30 }
  0x13   : > { %p1095_p7 = scmp.lt.s32.totalorder %s1086_s30, %s1086_s30 }
  0x14   : > { %p1077_p12 = pneg %p1280_p11 }
  0x15   : > { %p1096_p10 = por %p1095_p7, %p1094_p5 }
  0x16   : > { %p1089_p0 = pnand %p1087_p13, %p1077_p12 }
  0x18   : > { %p1090_p3 = pneg %p1089_p0 }
  0x1a   : > { %p1097_p2 = pnand %p1096_p10, %p1090_p3 }
  0x1c   : > { %1100 = shalt.err (!%p1097_p2)
}
  0x1d   : > { %s1200_s5 = smov 64   ;;  %s1201_s6 = smov 4  }
  0x1e   : > { %1015 = dma.hbm_to_vmem [thread:$0]  (!%p1280_p11), %s1569_s3, 1024, %s160_s25, [#allocation6], %s1200_s5, %s1200_s5, %s1201_s6  }
  0x1f   : > { %p26_p9 = scmp.eq.s32.totalorder %s25_s29, 0  ;;  %p35_p12 = scmp.ne.s32.totalorder %s1193_s17, %s1189_s16 }
  0x20   : > { %p36_p10 = scmp.eq.s32.totalorder %s1197_s18, 0  ;;  %p1025_p2 = scmp.lt.s32.totalorder %s1197_s18, 2 }
  0x21   : > { %s1302_s9 = scalar_select %p26_p9, %s1193_s17, %s28_s28  }
  0x22   : > { %p37_p13 = por %p36_p10, %p35_p12  ;;  %p1579_p0 = scmp.eq.s32.totalorder %s1252_s19, 1 }
  0x23   : > { %s173_s11 = sand.u32 1, %s1193_s17   ;;  %s753_s12 = sshll.u32 %s1197_s18, 7 }
  0x24   : > { %p1306_p3 = por %p1579_p0, %p35_p12  ;;  %s752_s13 = sshll.u32 %s173_s11, 3 }
  0x25   : > { %s1315_s24 = scalar_lea.hbm %s1566_s0, %s753_s12  ;;  %s177_s25 = scalar_lea.vmem [#allocation2], %s752_s13 }
  0x26   : > { %s1580_s10 = scalar_select %p1306_p3, 1, 0 }
  0x27   : > { %s184_s26 = sshll.u32 %s177_s25, 4  ;;  %p1317_p11 = pnand %p1025_p2, %p37_p13  ;;  %s185_s26 = int_to_ptr.vmem [resolvable:$true] %s184_s26 }
  0x28   : > { %s174_s29 = scalar_lea.sflag [#allocation3], %s173_s11  ;;  %s1101_s30 = scalar_lea.hbm %s1315_s24, 128 }
  0x29   : > { %p1102_p5 = scmp.ne.s32.totalorder %s1315_s24, %s1101_s30  ;;  %p1103_p7 = pneg %p1317_p11 }
  0x2a   : > { %s1106_s7 = scalar_lea.hbm %s1566_s0, 256  ;;  %p1107_p10 = scmp.lt.s32.totalorder %s1315_s24, %s1566_s0 }
  0x2b   : > { %p1104_p9 = pnand %p1103_p7, %p1102_p5  ;;  %p1108_p2 = scmp.lt.s32.totalorder %s1106_s7, %s1101_s30 }
  0x2d   : > { %p1105_p12 = pneg %p1104_p9  ;;  %p1109_p13 = por %p1108_p2, %p1107_p10 }
  0x2f   : > { %p1110_p0 = pnand %p1109_p13, %p1105_p12 }
  0x31   : > { %1113 = shalt.err (!%p1110_p0)
}
  0x32   : > { %s1114_s13 = scalar_lea.vmem %s185_s26, 128  ;;  %s1202_s11 = smov [#allocation2]  }
  0x33   : > { %p1115_p1 = scmp.ne.s32.totalorder %s185_s26, %s1114_s13  ;;  %s1119_s14 = sshll.u32 %s1202_s11, 4  ;;  %s1120_s14 = int_to_ptr.vmem [resolvable:$false] %s1119_s14 }
  0x34   : > { %s1121_s20 = scalar_lea.vmem %s1120_s14, 256  ;;  %p1122_p5 = scmp.lt.s32.totalorder %s185_s26, %s1120_s14 }
  0x35   : > { %p1117_p6 = pnand %p1115_p1, %p1103_p7  ;;  %p1123_p9 = scmp.lt.s32.totalorder %s1121_s20, %s1114_s13 }
  0x37   : > { %p1118_p3 = pneg %p1117_p6  ;;  %p1124_p4 = por %p1123_p9, %p1122_p5 }
  0x39   : > { %p1125_p8 = pnand %p1124_p4, %p1118_p3 }
  0x3b   : > { %1128 = shalt.err (!%p1125_p8)
}
  0x3c   : > { %1019 = dma.hbm_to_vmem [thread:$0]  (!%p1317_p11), %s1315_s24, 128, %s185_s26, %s174_s29  }
  0x3d   : > { %p1582_p12 = scmp.ne.s32.totalorder %s1577_s23, 0 }
  0x3e   : > { %s1338_s25 = sand.u32 (!%p1582_p12), 1, %s1189_s16   ;;  %p1583_p1 = scmp.ne.s32.totalorder (!%p1582_p12), %s1575_s21, 0 }
  0x3f   : > { %193 = sbr.rel (%p1582_p12) target bundleno = 953 (0x3b9), region = 36  ;;  %s755_s30 = sshll.u32 (!%p1582_p12), %s1338_s25, 3 }
  0x40   : > { %s196_s5 = scalar_lea.sflag (!%p1582_p12), [#allocation3], %s1338_s25  ;;  %s199_s6 = scalar_lea.vmem (!%p1582_p12), [#allocation2], %s755_s30 }
  0x44   : > { %1172 = dma.done.wait (%p1583_p1), %s196_s5, 128  }
  0x45   : > { %1174 = vsyncadd (%p1583_p1), %s196_s5, 4294967168  ;;  %p1584_p4 = scmp.eq.s32.totalorder %s1252_s19, 0 }
  0x47   : > { %1176 = dma.done.wait (%p1584_p4), [#allocation6], 1024   ;;  %p1585_p6 = pmov %p1584_p4 }
  0x48   : > { %v1203_v0 = vmov 0.0   ;;  %vm1204_vm0 = vmmov 0   ;;  %v1358_v1 = vld [vmem:[#allocation5 + $0x38] sm:$0xff]   ;;  %v1362_v2 = vld [vmem:[#allocation5 + $0x30] sm:$0xff]   ;;  %v1368_v3 = vld [vmem:[#allocation5 + $0x28] sm:$0xff]   ;;  %s769_s28 = sshll.u32 %s1252_s19, 7 }
  0x49   : > { %1178 = vsyncadd (%p1585_p6), [#allocation6], 4294966272  ;;  %844 = vmatprep.subr.bf16.mxu0 %v1203_v0  ;;  %864 = vmatprep.subr.bf16.mxu1 %v1203_v0  ;;  %v1374_v4 = vld [vmem:[#allocation5 + $0x20] sm:$0xff]   ;;  %v1380_v5 = vld [vmem:[#allocation5 + $0x18] sm:$0xff]   ;;  %s227_s29 = scalar_lea.vmem [#allocation7], %s755_s30  ;;  %s666_s13 = scalar_lea.hbm %s1570_s4, %s769_s28 }
  0x4a   : > { %860 = vmatprep.mubr.msk.bf16.mxu0 %vm1204_vm0, %v1203_v0  ;;  %880 = vmatprep.mubr.msk.bf16.mxu1 %vm1204_vm0, %v1203_v0  ;;  %v1382_v6 = vld [vmem:[%s199_s6] sm:$0xff]  ;;  %v1396_v10 = vld [vmem:[#allocation5 + $0x8] sm:$0xff]   ;;  %v1403_v12 = vld [vmem:[#allocation5] sm:$0xff]   ;;  %s668_s7 = sshll.u32 %s227_s29, 4  ;;  %s655_s11 = scalar_lea.sflag [#allocation4], %s1338_s25  ;;  %s669_s7 = int_to_ptr.vmem [resolvable:$true] %s668_s7 }
  0x4b   : > { %845 = vmatpush3.bf16.msra.mxu0 %v1358_v1  ;;  %865 = vmatpush3.bf16.msra.mxu1 %v1358_v1  ;;  %v246_v7 = vpack.c.bf16 %v1382_v6, %v1382_v6  ;;  %v1390_v8 = vld [vmem:[#allocation5 + $0x10] sm:$0xff]   ;;  %s1129_s14 = scalar_lea.vmem %s669_s7, 128  ;;  %p1586_p3 = scmp.ne.s32.totalorder %s1580_s10, 0 }
  0x4c   : > { %846 = vmatprep.subr.bf16.mxu0 %v1203_v0  ;;  %866 = vmatprep.subr.bf16.mxu1 %v1203_v0  ;;  %v766_v63 = vld [vmem:[%s1567_s1] ss:$0 sm:$0xff]  ;;  %p1130_p8 = scmp.ne.s32.totalorder %s669_s7, %s1129_s14  ;;  %s1205_s19 = smov [#allocation7]  }
  0x4d   : > { %v247_v9 = vunpack.c.l.bf16 %v246_v7  ;;  %s1133_s20 = sshll.u32 %s1205_s19, 4  ;;  %s1134_s20 = int_to_ptr.vmem [resolvable:$false] %s1133_s20 }
  0x4e   : > { %p1131_p11 = pnand %p1130_p8, %p1586_p3  ;;  %s1135_s30 = scalar_lea.vmem %s1134_s20, 256 }
  0x4f   : > { %847 = vmatpush3.bf16.msra.mxu0 %v1362_v2  ;;  %867 = vmatpush3.bf16.msra.mxu1 %v1362_v2  ;;  %v248_v11 = vsub.f32 %v1382_v6, %v247_v9  ;;  %p1136_p10 = scmp.lt.s32.totalorder %s669_s7, %s1134_s20  ;;  %p1137_p2 = scmp.lt.s32.totalorder %s1135_s30, %s1129_s14 }
  0x50   : > { %848 = vmatprep.subr.bf16.mxu0 %v1203_v0  ;;  %868 = vmatprep.subr.bf16.mxu1 %v1203_v0  ;;  %p1132_p7 = pneg %p1131_p11 }
  0x51   : > { %v249_v13 = vpack.c.bf16 %v248_v11, %v248_v11  ;;  %p1138_p13 = por %p1137_p2, %p1136_p10 }
  0x53   : > { %849 = vmatpush3.bf16.msra.mxu0 %v1368_v3  ;;  %869 = vmatpush3.bf16.msra.mxu1 %v1368_v3  ;;  %p1139_p0 = pnand %p1138_p13, %p1132_p7 }
  0x54   : > { %850 = vmatprep.subr.bf16.mxu0 %v1203_v0  ;;  %870 = vmatprep.subr.bf16.mxu1 %v1203_v0 }
  0x57   : > { %851 = vmatpush3.bf16.msra.mxu0 %v1374_v4  ;;  %871 = vmatpush3.bf16.msra.mxu1 %v1374_v4 }
  0x58   : > { %852 = vmatprep.subr.bf16.mxu0 %v1203_v0  ;;  %872 = vmatprep.subr.bf16.mxu1 %v1203_v0 }
  0x5b   : > { %853 = vmatpush3.bf16.msra.mxu0 %v1380_v5  ;;  %873 = vmatpush3.bf16.msra.mxu1 %v1380_v5 }
  0x5c   : > { %854 = vmatprep.subr.bf16.mxu0 %v1203_v0  ;;  %874 = vmatprep.subr.bf16.mxu1 %v1203_v0 }
  0x5f   : > { %855 = vmatpush3.bf16.msra.mxu0 %v1390_v8  ;;  %875 = vmatpush3.bf16.msra.mxu1 %v1390_v8 }
  0x60   : > { %856 = vmatprep.subr.bf16.mxu0 %v1203_v0  ;;  %876 = vmatprep.subr.bf16.mxu1 %v1203_v0 }
  0x63   : > { %857 = vmatpush3.bf16.msra.mxu0 %v1396_v10  ;;  %877 = vmatpush3.bf16.msra.mxu1 %v1396_v10 }
  0x64   : > { %858 = vmatprep.subr.bf16.mxu0 %v1203_v0  ;;  %878 = vmatprep.subr.bf16.mxu1 %v1203_v0 }
  0x67   : > { %859 = vmatpush3.bf16.msra.mxu0 %v1403_v12  ;;  %879 = vmatpush3.bf16.msra.mxu1 %v1403_v12 }
  0x68   : > { %904 = vmatprep.subr.bf16.mxu1 %v1203_v0  ;;  %884 = vmatprep.subr.bf16.mxu0 %v1203_v0 }
  0x6a   : > { %861 = vmatmul.mubr.bf16.vlgmr.msra.gmra.mxu0 %v249_v13  ;;  %881 = vmatmul.mubr.bf16.vlgmr.msra.gmra.mxu1 %v246_v7 }
  0x6b   : > { %905 = vmatpush3.bf16.xpose.msra.mxu1 %v1358_v1  ;;  %885 = vmatpush3.bf16.xpose.msra.mxu0 %v1358_v1 }
  0x6c   : > { %906 = vmatprep.subr.bf16.mxu1 %v1203_v0  ;;  %886 = vmatprep.subr.bf16.mxu0 %v1203_v0 }
  0x6d   : > { %920 = vmatprep.mubr.msk.bf16.mxu1 %vm1204_vm0, %v1203_v0  ;;  %900 = vmatprep.mubr.msk.bf16.mxu0 %vm1204_vm0, %v1203_v0 }
  0x73   : > { %907 = vmatpush3.bf16.xpose.msra.mxu1 %v1362_v2  ;;  %887 = vmatpush3.bf16.xpose.msra.mxu0 %v1362_v2 }
  0x74   : > { %908 = vmatprep.subr.bf16.mxu1 %v1203_v0  ;;  %888 = vmatprep.subr.bf16.mxu0 %v1203_v0 }
  0x7b   : > { %909 = vmatpush3.bf16.xpose.msra.mxu1 %v1368_v3  ;;  %889 = vmatpush3.bf16.xpose.msra.mxu0 %v1368_v3 }
  0x7c   : > { %910 = vmatprep.subr.bf16.mxu1 %v1203_v0  ;;  %890 = vmatprep.subr.bf16.mxu0 %v1203_v0 }
  0x83   : > { %911 = vmatpush3.bf16.xpose.msra.mxu1 %v1374_v4  ;;  %891 = vmatpush3.bf16.xpose.msra.mxu0 %v1374_v4 }
  0x84   : > { %912 = vmatprep.subr.bf16.mxu1 %v1203_v0  ;;  %892 = vmatprep.subr.bf16.mxu0 %v1203_v0 }
  0x8b   : > { %913 = vmatpush3.bf16.xpose.msra.mxu1 %v1380_v5  ;;  %893 = vmatpush3.bf16.xpose.msra.mxu0 %v1380_v5 }
  0x8c   : > { %914 = vmatprep.subr.bf16.mxu1 %v1203_v0  ;;  %894 = vmatprep.subr.bf16.mxu0 %v1203_v0 }
  0x93   : > { %915 = vmatpush3.bf16.xpose.msra.mxu1 %v1390_v8  ;;  %895 = vmatpush3.bf16.xpose.msra.mxu0 %v1390_v8 }
  0x94   : > { %916 = vmatprep.subr.bf16.mxu1 %v1203_v0  ;;  %896 = vmatprep.subr.bf16.mxu0 %v1203_v0 }
  0x9b   : > { %917 = vmatpush3.bf16.xpose.msra.mxu1 %v1396_v10  ;;  %897 = vmatpush3.bf16.xpose.msra.mxu0 %v1396_v10 }
  0x9c   : > { %918 = vmatprep.subr.bf16.mxu1 %v1203_v0  ;;  %898 = vmatprep.subr.bf16.mxu0 %v1203_v0 }
  0xa3   : > { %919 = vmatpush3.bf16.xpose.msra.mxu1 %v1403_v12  ;;  %899 = vmatpush3.bf16.xpose.msra.mxu0 %v1403_v12 }
  0xa4   : > { %944 = vmatprep.subr.bf16.mxu1 %v1203_v0  ;;  %924 = vmatprep.subr.bf16.mxu0 %v1203_v0 }
 0x12a   : > { %v332_v14 = vpop.f32.mrf.mxu0  ;;  %v372_v15 = vpop.f32.mrf.mxu1 }
 0x12b   : > { %v373_v16 = vadd.f32 %v372_v15, %v332_v14 }
 0x12c   : > { %v862_v17 = vpop.f32.mrf.mxu0  ;;  %v882_v18 = vpop.f32.mrf.mxu1 }
 0x12d   : > { %v378_v19 = vmul.f32 0.25, %v373_v16 }
 0x12e   : > { %v335_v20 = vpop.f32.mrf.mxu0  ;;  %v375_v21 = vpop.f32.mrf.mxu1 }
 0x12f   : > { %v379_v22 = vpack.c.bf16 %v378_v19, %v378_v19 }
 0x130   : > { %v863_v23 = vpop.f32.mrf.mxu0  ;;  %v883_v24 = vpop.f32.mrf.mxu1 }
 0x131   : > { %v380_v25 = vunpack.c.l.bf16 %v379_v22  ;;  %921 = vmatmul.mubr.bf16.vlgmr.msra.gmra.mxu1 %v379_v22 }
 0x132   : > { %945 = vmatpush3.bf16.msra.mxu1 %v1358_v1  ;;  %960 = vmatprep.mubr.msk.bf16.mxu1 %vm1204_vm0, %v1203_v0 }
 0x133   : > { %v381_v26 = vsub.f32 %v378_v19, %v380_v25  ;;  %946 = vmatprep.subr.bf16.mxu1 %v1203_v0 }
 0x135   : > { %v382_v27 = vpack.c.bf16 %v381_v26, %v381_v26 }
 0x136   : > { %947 = vmatpush3.bf16.msra.mxu1 %v1362_v2 }
 0x137   : > { %901 = vmatmul.mubr.bf16.vlgmr.msra.gmra.mxu0 %v382_v27  ;;  %948 = vmatprep.subr.bf16.mxu1 %v1203_v0 }
 0x138   : > { %925 = vmatpush3.bf16.msra.mxu0 %v1358_v1  ;;  %940 = vmatprep.mubr.msk.bf16.mxu0 %vm1204_vm0, %v1203_v0 }
 0x139   : > { %926 = vmatprep.subr.bf16.mxu0 %v1203_v0 }
 0x13a   : > { %949 = vmatpush3.bf16.msra.mxu1 %v1368_v3 }
 0x13b   : > { %950 = vmatprep.subr.bf16.mxu1 %v1203_v0 }
 0x13c   : > { %927 = vmatpush3.bf16.msra.mxu0 %v1362_v2 }
 0x13d   : > { %928 = vmatprep.subr.bf16.mxu0 %v1203_v0 }
 0x13e   : > { %951 = vmatpush3.bf16.msra.mxu1 %v1374_v4 }
 0x13f   : > { %952 = vmatprep.subr.bf16.mxu1 %v1203_v0 }
 0x140   : > { %929 = vmatpush3.bf16.msra.mxu0 %v1368_v3 }
 0x141   : > { %930 = vmatprep.subr.bf16.mxu0 %v1203_v0 }
 0x142   : > { %953 = vmatpush3.bf16.msra.mxu1 %v1380_v5 }
 0x143   : > { %954 = vmatprep.subr.bf16.mxu1 %v1203_v0 }
 0x144   : > { %931 = vmatpush3.bf16.msra.mxu0 %v1374_v4 }
 0x145   : > { %932 = vmatprep.subr.bf16.mxu0 %v1203_v0 }
 0x146   : > { %955 = vmatpush3.bf16.msra.mxu1 %v1390_v8 }
 0x147   : > { %956 = vmatprep.subr.bf16.mxu1 %v1203_v0 }
 0x148   : > { %933 = vmatpush3.bf16.msra.mxu0 %v1380_v5 }
 0x149   : > { %934 = vmatprep.subr.bf16.mxu0 %v1203_v0 }
 0x14a   : > { %957 = vmatpush3.bf16.msra.mxu1 %v1396_v10 }
 0x14b   : > { %958 = vmatprep.subr.bf16.mxu1 %v1203_v0 }
 0x14c   : > { %935 = vmatpush3.bf16.msra.mxu0 %v1390_v8 }
 0x14d   : > { %936 = vmatprep.subr.bf16.mxu0 %v1203_v0 }
 0x14e   : > { %959 = vmatpush3.bf16.msra.mxu1 %v1403_v12 }
 0x14f   : > { %984 = vmatprep.subr.bf16.mxu1 %v1203_v0 }
 0x150   : > { %937 = vmatpush3.bf16.msra.mxu0 %v1396_v10 }
 0x151   : > { %938 = vmatprep.subr.bf16.mxu0 %v1203_v0 }
 0x154   : > { %939 = vmatpush3.bf16.msra.mxu0 %v1403_v12 }
 0x155   : > { %964 = vmatprep.subr.bf16.mxu0 %v1203_v0 }
 0x1f1   : > { %v457_v28 = vpop.f32.mrf.mxu1 }
 0x1f3   : > { %v922_v29 = vpop.f32.mrf.mxu1 }
 0x1f5   : > { %v460_v30 = vpop.f32.mrf.mxu1 }
 0x1f7   : > { %v417_v31 = vpop.f32.mrf.mxu0  ;;  %v923_v32 = vpop.f32.mrf.mxu1 }
 0x1f8   : > { %v458_v33 = vadd.f32 %v457_v28, %v417_v31 }
 0x1f9   : > { %v902_v34 = vpop.f32.mrf.mxu0 }
 0x1fa   : > { %v1484_v35 = vsub.f32 %v1382_v6, %v458_v33 }
 0x1fb   : > { %v420_v36 = vpop.f32.mrf.mxu0 }
 0x1fc   : > { %v464_v37 = vmul.f32 %v1484_v35, %v1484_v35 }
 0x1fd   : > { %v903_v38 = vpop.f32.mrf.mxu0 }
 0x1fe   : > { %v465_v39 = vpack.c.bf16 %v464_v37, %v464_v37 }
 0x200   : > { %v466_v40 = vunpack.c.l.bf16 %v465_v39  ;;  %961 = vmatmul.mubr.bf16.vlgmr.msra.gmra.mxu1 %v465_v39 }
 0x201   : > { %985 = vmatpush3.bf16.xpose.msra.mxu1 %v1358_v1  ;;  %1000 = vmatprep.mubr.msk.bf16.mxu1 %vm1204_vm0, %v1203_v0 }
 0x202   : > { %v467_v41 = vsub.f32 %v464_v37, %v466_v40  ;;  %986 = vmatprep.subr.bf16.mxu1 %v1203_v0 }
 0x204   : > { %v468_v42 = vpack.c.bf16 %v467_v41, %v467_v41 }
 0x206   : > { %941 = vmatmul.mubr.bf16.vlgmr.msra.gmra.mxu0 %v468_v42 }
 0x207   : > { %965 = vmatpush3.bf16.xpose.msra.mxu0 %v1358_v1  ;;  %980 = vmatprep.mubr.msk.bf16.mxu0 %vm1204_vm0, %v1203_v0 }
 0x208   : > { %966 = vmatprep.subr.bf16.mxu0 %v1203_v0 }
 0x209   : > { %987 = vmatpush3.bf16.xpose.msra.mxu1 %v1362_v2 }
 0x20a   : > { %988 = vmatprep.subr.bf16.mxu1 %v1203_v0 }
 0x20f   : > { %967 = vmatpush3.bf16.xpose.msra.mxu0 %v1362_v2 }
 0x210   : > { %968 = vmatprep.subr.bf16.mxu0 %v1203_v0 }
 0x211   : > { %989 = vmatpush3.bf16.xpose.msra.mxu1 %v1368_v3 }
 0x212   : > { %990 = vmatprep.subr.bf16.mxu1 %v1203_v0 }
 0x217   : > { %969 = vmatpush3.bf16.xpose.msra.mxu0 %v1368_v3 }
 0x218   : > { %970 = vmatprep.subr.bf16.mxu0 %v1203_v0 }
 0x219   : > { %991 = vmatpush3.bf16.xpose.msra.mxu1 %v1374_v4 }
 0x21a   : > { %992 = vmatprep.subr.bf16.mxu1 %v1203_v0 }
 0x21f   : > { %971 = vmatpush3.bf16.xpose.msra.mxu0 %v1374_v4  ;;  %v767_v4 = vld [vmem:[%s1568_s2] ss:$0 sm:$0xff] }
 0x220   : > { %972 = vmatprep.subr.bf16.mxu0 %v1203_v0 }
 0x221   : > { %993 = vmatpush3.bf16.xpose.msra.mxu1 %v1380_v5 }
 0x222   : > { %994 = vmatprep.subr.bf16.mxu1 %v1203_v0 }
 0x227   : > { %973 = vmatpush3.bf16.xpose.msra.mxu0 %v1380_v5 }
 0x228   : > { %974 = vmatprep.subr.bf16.mxu0 %v1203_v0 }
 0x229   : > { %995 = vmatpush3.bf16.xpose.msra.mxu1 %v1390_v8 }
 0x22a   : > { %996 = vmatprep.subr.bf16.mxu1 %v1203_v0 }
 0x22f   : > { %975 = vmatpush3.bf16.xpose.msra.mxu0 %v1390_v8 }
 0x230   : > { %976 = vmatprep.subr.bf16.mxu0 %v1203_v0 }
 0x231   : > { %997 = vmatpush3.bf16.xpose.msra.mxu1 %v1396_v10 }
 0x232   : > { %998 = vmatprep.subr.bf16.mxu1 %v1203_v0 }
 0x237   : > { %977 = vmatpush3.bf16.xpose.msra.mxu0 %v1396_v10 }
 0x238   : > { %978 = vmatprep.subr.bf16.mxu0 %v1203_v0 }
 0x239   : > { %999 = vmatpush3.bf16.xpose.msra.mxu1 %v1403_v12 }
 0x23f   : > { %979 = vmatpush3.bf16.xpose.msra.mxu0 %v1403_v12 }
 0x2c0   : > { %v543_v43 = vpop.f32.mrf.mxu1 }
 0x2c2   : > { %v962_v44 = vpop.f32.mrf.mxu1 }
 0x2c4   : > { %v546_v45 = vpop.f32.mrf.mxu1 }
 0x2c6   : > { %v503_v46 = vpop.f32.mrf.mxu0  ;;  %v963_v47 = vpop.f32.mrf.mxu1 }
 0x2c7   : > { %v544_v48 = vadd.f32 %v543_v43, %v503_v46 }
 0x2c8   : > { %v942_v49 = vpop.f32.mrf.mxu0 }
 0x2c9   : > { %v549_v50 = vmul.f32 0.25, %v544_v48 }
 0x2ca   : > { %v506_v51 = vpop.f32.mrf.mxu0 }
 0x2cb   : > { %v550_v52 = vadd.f32 1e-05, %v549_v50 }
 0x2cc   : > { %v943_v53 = vpop.f32.mrf.mxu0 }
 0x2cd   : > { %1073 = vrsqrt.f32 %v550_v52 }
 0x2da   : > { %v1074_v54 = vpop.eup %1073 }
 0x2db   : > { %v552_v55 = vpack.c.bf16 %v1074_v54, %v1074_v54 }
 0x2dd   : > { %v553_v56 = vunpack.c.l.bf16 %v552_v55  ;;  %1001 = vmatmul.mubr.bf16.vlgmr.msra.gmra.mxu1 %v552_v55 }
 0x2df   : > { %v554_v57 = vsub.f32 %v1074_v54, %v553_v56 }
 0x2e1   : > { %v555_v58 = vpack.c.bf16 %v554_v57, %v554_v57 }
 0x2e3   : > { %981 = vmatmul.mubr.bf16.vlgmr.msra.gmra.mxu0 %v555_v58 }
 0x39d   : > { %v630_v59 = vpop.f32.mrf.mxu1 }
 0x39f   : > { %v1002_v60 = vpop.f32.mrf.mxu1 }
 0x3a1   : > { %v633_v61 = vpop.f32.mrf.mxu1 }
 0x3a3   : > { %v590_v62 = vpop.f32.mrf.mxu0  ;;  %v1003_v0 = vpop.f32.mrf.mxu1 }
 0x3a4   : > { %v631_v1 = vadd.f32 %v630_v59, %v590_v62 }
 0x3a5   : > { %v982_v2 = vpop.f32.mrf.mxu0 }
 0x3a6   : > { %v643_v3 = vmul.f32 %v766_v63, %v631_v1 }
 0x3a7   : > { %v593_v5 = vpop.f32.mrf.mxu0 }
 0x3a8   : > { %v644_v6 = vmul.f32 %v643_v3, %v1484_v35 }
 0x3a9   : > { %v983_v7 = vpop.f32.mrf.mxu0 }
 0x3aa   : > { %v652_v8 = vadd.f32 %v767_v4, %v644_v6 }
 0x3ac   : > { %653 = vst [vmem:[%s227_s29] sm:$0xff] %v652_v8 }
 0x3ad   : > { %1142 = shalt.err (!%p1139_p0)
}
 0x3ae   : > { %s1143_s5 = scalar_lea.hbm %s666_s13, 128  ;;  %s1147_s21 = scalar_lea.hbm %s1570_s4, 256 }
 0x3af   : > { %p1144_p5 = scmp.ne.s32.totalorder %s666_s13, %s1143_s5  ;;  %p1148_p1 = scmp.lt.s32.totalorder %s666_s13, %s1570_s4 }
 0x3b0   : > { %p1149_p4 = scmp.lt.s32.totalorder %s1147_s21, %s1143_s5 }
 0x3b1   : > { %p1145_p9 = pnand %p1144_p5, %p1586_p3 }
 0x3b2   : > { %p1150_p6 = por %p1149_p4, %p1148_p1 }
 0x3b3   : > { %p1146_p12 = pneg %p1145_p9 }
 0x3b5   : > { %p1151_p8 = pnand %p1150_p6, %p1146_p12 }
 0x3b7   : > { %1154 = shalt.err (!%p1151_p8)
}
 0x3b8   : > { %1010 = dma.vmem_to_hbm [thread:$0]  (%p1586_p3), %s669_s7, 128, %s666_s13, %s655_s11  }
 0x3b9 PF: > { %s680_s26 = sand.u32 1, %s1185_s15   ;;  %p1587_p11 = scmp.ne.s32.totalorder %s1576_s22, 0 }
 0x3ba   : > { %p1588_p7 = scmp.ge.s32.totalorder %s1197_s18, 2  ;;  %s681_s28 = scalar_lea.sflag [#allocation4], %s680_s26 }
 0x3bc   : > { %p1021_p10 = pnand %p1588_p7, %p1587_p11 }
 0x3be   : > { %p1022_p2 = pneg %p1021_p10 }
 0x3c0   : > { %1180 = dma.done.wait (%p1022_p2), %s681_s28, 128  }
 0x3c1   : > { %1182 = vsyncadd (%p1022_p2), %s681_s28, 4294967168  ;;  %p18_p13 = scmp.ge.s32.totalorder %s1285_s27, 4   ;;  %s1589_s15 = smov %s1189_s16 }
 0x3c2   : > { %s1590_s16 = smov %s1193_s17  ;;  %s1591_s17 = smov %s1302_s9 }
 0x3c3   : > { %s1592_s18 = smov %s1285_s27  ;;  %20 = sbr.rel (!%p18_p13) target bundleno = 6 (0x6), region = 85 }
 0x3c8   :  { %686 = vsyncpa [#allocation3], 1 }
 0x3c9   :  { %688 = vsyncpa [#allocation3 + $0x1], 1 }
 0x3ca   :  { %689 = vsyncpa [#allocation6], 1 }
 0x3cb   :  { %690 = vsyncpa [#allocation4], 1 }
 0x3cc   :  { %692 = vsyncpa [#allocation4 + $0x1], 1 }

// kernel: tpu_custom_call.1
= control target key start
LH: loop header
LB: loop body
LE: loop exit
PB: predicated region body
PF: predicated region fallthrough
CT: control target
= control target key end

     0   :  { %9 = vsyncpa [#allocation3], 0  ;;  %s1566_s0 = inlined_call_operand.hbm [shape: f32[16,128], index: 0, kind: input, shape index: {}]   ;;  %s1567_s1 = inlined_call_operand.vmem [shape: f32[1,128], index: 1, kind: input, shape index: {}]   ;;  %s1568_s2 = inlined_call_operand.vmem [shape: f32[1,128], index: 2, kind: input, shape index: {}]   ;;  %s1569_s3 = inlined_call_operand.hbm [shape: bf16[128,128], index: 3, kind: input, shape index: {}]   ;;  %s1570_s4 = inlined_call_operand.hbm [shape: f32[16,128], index: 4, kind: output, shape index: {}]  }
   0x1   :  { %11 = vsyncpa [#allocation3 + $0x1], 0 }
   0x2   :  { %12 = vsyncpa [#allocation6], 0 }
   0x3   :  { %13 = vsyncpa [#allocation4], 0 }
   0x4   :  { %15 = vsyncpa [#allocation4 + $0x1], 0  ;;  %s1231_s15 = smov 0   ;;  %s1233_s16 = smov 0  }
   0x5   :  { %s1235_s17 = smov 0   ;;  %s1237_s18 = smov 0  }
   0x6 LB: > { %s1252_s19 = sadd.s32 4294967295, %s1197_s18   ;;  %s748_s20 = sadd.s32 4294967294, %s1197_s18   ;;  %s1197_s18 = sphi %s1237_s18, %s1592_s18   ;;  %s1193_s17 = sphi %s1235_s17, %s1591_s17   ;;  %s1189_s16 = sphi %s1233_s16, %s1590_s16   ;;  %s1185_s15 = sphi %s1231_s15, %s1589_s15  }
   0x7   : > { %p41_p0 = scmp.ne.s32.totalorder %s1189_s16, %s1185_s15  ;;  %p1571_p1 = scmp.eq.s32.totalorder %s1252_s19, 0 }
   0x8   : > { %p134_p3 = scmp.eq.s32.totalorder %s748_s20, 1  ;;  %p749_p5 = scmp.ge.s32.totalorder %s1197_s18, 1 }
   0x9   : > { %p1261_p4 = por %p1571_p1, %p41_p0  ;;  %p141_p7 = scmp.lt.s32.totalorder %s1197_s18, 3 }
   0xa   : > { %p1266_p6 = por %p134_p3, %p41_p0  ;;  %s1199_s24 = smov [#allocation5]  }
   0xb   : > { %s1575_s21 = scalar_select %p1261_p4, 1, 0 }
   0xc   : > { %s1576_s22 = scalar_select %p1266_p6, 1, 0 }
   0xd   : > { %p1271_p8 = pnand %p749_p5, %p141_p7  ;;  %s159_s25 = sshll.u32 %s1199_s24, 4  ;;  %s160_s25 = int_to_ptr.vmem [resolvable:$true] %s159_s25 }
   0xe   : > { %s1285_s27 = sadd.s32 1, %s1197_s18   ;;  %s28_s28 = sadd.s32 1, %s1193_s17 }
   0xf   : > { %s1577_s23 = scalar_select %p1271_p8, 1, 0 }
  0x10   : > { %p1012_p9 = pneg %p1271_p8  ;;  %s25_s29 = ssub.s32 %s1197_s18, %s1285_s27 }
  0x11   : > { %s1086_s30 = scalar_lea.vmem %s160_s25, 1024  ;;  %p1094_p5 = scmp.lt.s32.totalorder %s160_s25, %s160_s25 }
  0x12   : > { %p1280_p11 = pnand %p1012_p9, %p1571_p1  ;;  %p1087_p13 = scmp.ne.s32.totalorder %s160_s25, %s1086_s30 }
  0x13   : > { %p1095_p7 = scmp.lt.s32.totalorder %s1086_s30, %s1086_s30 }
  0x14   : > { %p1077_p12 = pneg %p1280_p11 }
  0x15   : > { %p1096_p10 = por %p1095_p7, %p1094_p5 }
  0x16   : > { %p1089_p0 = pnand %p1087_p13, %p1077_p12 }
  0x18   : > { %p1090_p3 = pneg %p1089_p0 }
  0x1a   : > { %p1097_p2 = pnand %p1096_p10, %p1090_p3 }
  0x1c   : > { %1100 = shalt.err (!%p1097_p2)
}
  0x1d   : > { %s1200_s5 = smov 64   ;;  %s1201_s6 = smov 4  }
  0x1e   : > { %1015 = dma.hbm_to_vmem [thread:$0]  (!%p1280_p11), %s1569_s3, 1024, %s160_s25, [#allocation6], %s1200_s5, %s1200_s5, %s1201_s6  }
  0x1f   : > { %p26_p9 = scmp.eq.s32.totalorder %s25_s29, 0  ;;  %p35_p12 = scmp.ne.s32.totalorder %s1193_s17, %s1189_s16 }
  0x20   : > { %p36_p10 = scmp.eq.s32.totalorder %s1197_s18, 0  ;;  %p1025_p2 = scmp.lt.s32.totalorder %s1197_s18, 2 }
  0x21   : > { %s1302_s9 = scalar_select %p26_p9, %s1193_s17, %s28_s28  }
  0x22   : > { %p37_p13 = por %p36_p10, %p35_p12  ;;  %p1579_p0 = scmp.eq.s32.totalorder %s1252_s19, 1 }
  0x23   : > { %s173_s11 = sand.u32 1, %s1193_s17   ;;  %s753_s12 = sshll.u32 %s1197_s18, 7 }
  0x24   : > { %p1306_p3 = por %p1579_p0, %p35_p12  ;;  %s752_s13 = sshll.u32 %s173_s11, 3 }
  0x25   : > { %s1315_s24 = scalar_lea.hbm %s1566_s0, %s753_s12  ;;  %s177_s25 = scalar_lea.vmem [#allocation2], %s752_s13 }
  0x26   : > { %s1580_s10 = scalar_select %p1306_p3, 1, 0 }
  0x27   : > { %s184_s26 = sshll.u32 %s177_s25, 4  ;;  %p1317_p11 = pnand %p1025_p2, %p37_p13  ;;  %s185_s26 = int_to_ptr.vmem [resolvable:$true] %s184_s26 }
  0x28   : > { %s174_s29 = scalar_lea.sflag [#allocation3], %s173_s11  ;;  %s1101_s30 = scalar_lea.hbm %s1315_s24, 128 }
  0x29   : > { %p1102_p5 = scmp.ne.s32.totalorder %s1315_s24, %s1101_s30  ;;  %p1103_p7 = pneg %p1317_p11 }
  0x2a   : > { %s1106_s7 = scalar_lea.hbm %s1566_s0, 256  ;;  %p1107_p10 = scmp.lt.s32.totalorder %s1315_s24, %s1566_s0 }
  0x2b   : > { %p1104_p9 = pnand %p1103_p7, %p1102_p5  ;;  %p1108_p2 = scmp.lt.s32.totalorder %s1106_s7, %s1101_s30 }
  0x2d   : > { %p1105_p12 = pneg %p1104_p9  ;;  %p1109_p13 = por %p1108_p2, %p1107_p10 }
  0x2f   : > { %p1110_p0 = pnand %p1109_p13, %p1105_p12 }
  0x31   : > { %1113 = shalt.err (!%p1110_p0)
}
  0x32   : > { %s1114_s13 = scalar_lea.vmem %s185_s26, 128  ;;  %s1202_s11 = smov [#allocation2]  }
  0x33   : > { %p1115_p1 = scmp.ne.s32.totalorder %s185_s26, %s1114_s13  ;;  %s1119_s14 = sshll.u32 %s1202_s11, 4  ;;  %s1120_s14 = int_to_ptr.vmem [resolvable:$false] %s1119_s14 }
  0x34   : > { %s1121_s20 = scalar_lea.vmem %s1120_s14, 256  ;;  %p1122_p5 = scmp.lt.s32.totalorder %s185_s26, %s1120_s14 }
  0x35   : > { %p1117_p6 = pnand %p1115_p1, %p1103_p7  ;;  %p1123_p9 = scmp.lt.s32.totalorder %s1121_s20, %s1114_s13 }
  0x37   : > { %p1118_p3 = pneg %p1117_p6  ;;  %p1124_p4 = por %p1123_p9, %p1122_p5 }
  0x39   : > { %p1125_p8 = pnand %p1124_p4, %p1118_p3 }
  0x3b   : > { %1128 = shalt.err (!%p1125_p8)
}
  0x3c   : > { %1019 = dma.hbm_to_vmem [thread:$0]  (!%p1317_p11), %s1315_s24, 128, %s185_s26, %s174_s29  }
  0x3d   : > { %p1582_p12 = scmp.ne.s32.totalorder %s1577_s23, 0 }
  0x3e   : > { %s1338_s25 = sand.u32 (!%p1582_p12), 1, %s1189_s16   ;;  %p1583_p1 = scmp.ne.s32.totalorder (!%p1582_p12), %s1575_s21, 0 }
  0x3f   : > { %193 = sbr.rel (%p1582_p12) target bundleno = 953 (0x3b9), region = 36  ;;  %s755_s30 = sshll.u32 (!%p1582_p12), %s1338_s25, 3 }
  0x40   : > { %s196_s5 = scalar_lea.sflag (!%p1582_p12), [#allocation3], %s1338_s25  ;;  %s199_s6 = scalar_lea.vmem (!%p1582_p12), [#allocation2], %s755_s30 }
  0x44   : > { %1172 = dma.done.wait (%p1583_p1), %s196_s5, 128  }
  0x45   : > { %1174 = vsyncadd (%p1583_p1), %s196_s5, 4294967168  ;;  %p1584_p4 = scmp.eq.s32.totalorder %s1252_s19, 0 }
  0x47   : > { %1176 = dma.done.wait (%p1584_p4), [#allocation6], 1024   ;;  %p1585_p6 = pmov %p1584_p4 }
  0x48   : > { %v1203_v0 = vmov 0.0   ;;  %vm1204_vm0 = vmmov 0   ;;  %v1358_v1 = vld [vmem:[#allocation5 + $0x38] sm:$0xff]   ;;  %v1362_v2 = vld [vmem:[#allocation5 + $0x30] sm:$0xff]   ;;  %v1368_v3 = vld [vmem:[#allocation5 + $0x28] sm:$0xff]   ;;  %s769_s28 = sshll.u32 %s1252_s19, 7 }
  0x49   : > { %1178 = vsyncadd (%p1585_p6), [#allocation6], 4294966272  ;;  %844 = vmatprep.subr.bf16.mxu0 %v1203_v0  ;;  %864 = vmatprep.subr.bf16.mxu1 %v1203_v0  ;;  %v1374_v4 = vld [vmem:[#allocation5 + $0x20] sm:$0xff]   ;;  %v1380_v5 = vld [vmem:[#allocation5 + $0x18] sm:$0xff]   ;;  %s227_s29 = scalar_lea.vmem [#allocation7], %s755_s30  ;;  %s666_s13 = scalar_lea.hbm %s1570_s4, %s769_s28 }
  0x4a   : > { %860 = vmatprep.mubr.msk.bf16.mxu0 %vm1204_vm0, %v1203_v0  ;;  %880 = vmatprep.mubr.msk.bf16.mxu1 %vm1204_vm0, %v1203_v0  ;;  %v1382_v6 = vld [vmem:[%s199_s6] sm:$0xff]  ;;  %v1396_v10 = vld [vmem:[#allocation5 + $0x8] sm:$0xff]   ;;  %v1403_v12 = vld [vmem:[#allocation5] sm:$0xff]   ;;  %s668_s7 = sshll.u32 %s227_s29, 4  ;;  %s655_s11 = scalar_lea.sflag [#allocation4], %s1338_s25  ;;  %s669_s7 = int_to_ptr.vmem [resolvable:$true] %s668_s7 }
  0x4b   : > { %845 = vmatpush3.bf16.msra.mxu0 %v1358_v1  ;;  %865 = vmatpush3.bf16.msra.mxu1 %v1358_v1  ;;  %v246_v7 = vpack.c.bf16 %v1382_v6, %v1382_v6  ;;  %v1390_v8 = vld [vmem:[#allocation5 + $0x10] sm:$0xff]   ;;  %s1129_s14 = scalar_lea.vmem %s669_s7, 128  ;;  %p1586_p3 = scmp.ne.s32.totalorder %s1580_s10, 0 }
  0x4c   : > { %846 = vmatprep.subr.bf16.mxu0 %v1203_v0  ;;  %866 = vmatprep.subr.bf16.mxu1 %v1203_v0  ;;  %v766_v63 = vld [vmem:[%s1567_s1] ss:$0 sm:$0xff]  ;;  %p1130_p8 = scmp.ne.s32.totalorder %s669_s7, %s1129_s14  ;;  %s1205_s19 = smov [#allocation7]  }
  0x4d   : > { %v247_v9 = vunpack.c.l.bf16 %v246_v7  ;;  %s1133_s20 = sshll.u32 %s1205_s19, 4  ;;  %s1134_s20 = int_to_ptr.vmem [resolvable:$false] %s1133_s20 }
  0x4e   : > { %p1131_p11 = pnand %p1130_p8, %p1586_p3  ;;  %s1135_s30 = scalar_lea.vmem %s1134_s20, 256 }
  0x4f   : > { %847 = vmatpush3.bf16.msra.mxu0 %v1362_v2  ;;  %867 = vmatpush3.bf16.msra.mxu1 %v1362_v2  ;;  %v248_v11 = vsub.f32 %v1382_v6, %v247_v9  ;;  %p1136_p10 = scmp.lt.s32.totalorder %s669_s7, %s1134_s20  ;;  %p1137_p2 = scmp.lt.s32.totalorder %s1135_s30, %s1129_s14 }
  0x50   : > { %848 = vmatprep.subr.bf16.mxu0 %v1203_v0  ;;  %868 = vmatprep.subr.bf16.mxu1 %v1203_v0  ;;  %p1132_p7 = pneg %p1131_p11 }
  0x51   : > { %v249_v13 = vpack.c.bf16 %v248_v11, %v248_v11  ;;  %p1138_p13 = por %p1137_p2, %p1136_p10 }
  0x53   : > { %849 = vmatpush3.bf16.msra.mxu0 %v1368_v3  ;;  %869 = vmatpush3.bf16.msra.mxu1 %v1368_v3  ;;  %p1139_p0 = pnand %p1138_p13, %p1132_p7 }
  0x54   : > { %850 = vmatprep.subr.bf16.mxu0 %v1203_v0  ;;  %870 = vmatprep.subr.bf16.mxu1 %v1203_v0 }
  0x57   : > { %851 = vmatpush3.bf16.msra.mxu0 %v1374_v4  ;;  %871 = vmatpush3.bf16.msra.mxu1 %v1374_v4 }
  0x58   : > { %852 = vmatprep.subr.bf16.mxu0 %v1203_v0  ;;  %872 = vmatprep.subr.bf16.mxu1 %v1203_v0 }
  0x5b   : > { %853 = vmatpush3.bf16.msra.mxu0 %v1380_v5  ;;  %873 = vmatpush3.bf16.msra.mxu1 %v1380_v5 }
  0x5c   : > { %854 = vmatprep.subr.bf16.mxu0 %v1203_v0  ;;  %874 = vmatprep.subr.bf16.mxu1 %v1203_v0 }
  0x5f   : > { %855 = vmatpush3.bf16.msra.mxu0 %v1390_v8  ;;  %875 = vmatpush3.bf16.msra.mxu1 %v1390_v8 }
  0x60   : > { %856 = vmatprep.subr.bf16.mxu0 %v1203_v0  ;;  %876 = vmatprep.subr.bf16.mxu1 %v1203_v0 }
  0x63   : > { %857 = vmatpush3.bf16.msra.mxu0 %v1396_v10  ;;  %877 = vmatpush3.bf16.msra.mxu1 %v1396_v10 }
  0x64   : > { %858 = vmatprep.subr.bf16.mxu0 %v1203_v0  ;;  %878 = vmatprep.subr.bf16.mxu1 %v1203_v0 }
  0x67   : > { %859 = vmatpush3.bf16.msra.mxu0 %v1403_v12  ;;  %879 = vmatpush3.bf16.msra.mxu1 %v1403_v12 }
  0x68   : > { %904 = vmatprep.subr.bf16.mxu1 %v1203_v0  ;;  %884 = vmatprep.subr.bf16.mxu0 %v1203_v0 }
  0x6a   : > { %861 = vmatmul.mubr.bf16.vlgmr.msra.gmra.mxu0 %v249_v13  ;;  %881 = vmatmul.mubr.bf16.vlgmr.msra.gmra.mxu1 %v246_v7 }
  0x6b   : > { %905 = vmatpush3.bf16.xpose.msra.mxu1 %v1358_v1  ;;  %885 = vmatpush3.bf16.xpose.msra.mxu0 %v1358_v1 }
  0x6c   : > { %906 = vmatprep.subr.bf16.mxu1 %v1203_v0  ;;  %886 = vmatprep.subr.bf16.mxu0 %v1203_v0 }
  0x6d   : > { %920 = vmatprep.mubr.msk.bf16.mxu1 %vm1204_vm0, %v1203_v0  ;;  %900 = vmatprep.mubr.msk.bf16.mxu0 %vm1204_vm0, %v1203_v0 }
  0x73   : > { %907 = vmatpush3.bf16.xpose.msra.mxu1 %v1362_v2  ;;  %887 = vmatpush3.bf16.xpose.msra.mxu0 %v1362_v2 }
  0x74   : > { %908 = vmatprep.subr.bf16.mxu1 %v1203_v0  ;;  %888 = vmatprep.subr.bf16.mxu0 %v1203_v0 }
  0x7b   : > { %909 = vmatpush3.bf16.xpose.msra.mxu1 %v1368_v3  ;;  %889 = vmatpush3.bf16.xpose.msra.mxu0 %v1368_v3 }
  0x7c   : > { %910 = vmatprep.subr.bf16.mxu1 %v1203_v0  ;;  %890 = vmatprep.subr.bf16.mxu0 %v1203_v0 }
  0x83   : > { %911 = vmatpush3.bf16.xpose.msra.mxu1 %v1374_v4  ;;  %891 = vmatpush3.bf16.xpose.msra.mxu0 %v1374_v4 }
  0x84   : > { %912 = vmatprep.subr.bf16.mxu1 %v1203_v0  ;;  %892 = vmatprep.subr.bf16.mxu0 %v1203_v0 }
  0x8b   : > { %913 = vmatpush3.bf16.xpose.msra.mxu1 %v1380_v5  ;;  %893 = vmatpush3.bf16.xpose.msra.mxu0 %v1380_v5 }
  0x8c   : > { %914 = vmatprep.subr.bf16.mxu1 %v1203_v0  ;;  %894 = vmatprep.subr.bf16.mxu0 %v1203_v0 }
  0x93   : > { %915 = vmatpush3.bf16.xpose.msra.mxu1 %v1390_v8  ;;  %895 = vmatpush3.bf16.xpose.msra.mxu0 %v1390_v8 }
  0x94   : > { %916 = vmatprep.subr.bf16.mxu1 %v1203_v0  ;;  %896 = vmatprep.subr.bf16.mxu0 %v1203_v0 }
  0x9b   : > { %917 = vmatpush3.bf16.xpose.msra.mxu1 %v1396_v10  ;;  %897 = vmatpush3.bf16.xpose.msra.mxu0 %v1396_v10 }
  0x9c   : > { %918 = vmatprep.subr.bf16.mxu1 %v1203_v0  ;;  %898 = vmatprep.subr.bf16.mxu0 %v1203_v0 }
  0xa3   : > { %919 = vmatpush3.bf16.xpose.msra.mxu1 %v1403_v12  ;;  %899 = vmatpush3.bf16.xpose.msra.mxu0 %v1403_v12 }
  0xa4   : > { %944 = vmatprep.subr.bf16.mxu1 %v1203_v0  ;;  %924 = vmatprep.subr.bf16.mxu0 %v1203_v0 }
 0x12a   : > { %v332_v14 = vpop.f32.mrf.mxu0  ;;  %v372_v15 = vpop.f32.mrf.mxu1 }
 0x12b   : > { %v373_v16 = vadd.f32 %v372_v15, %v332_v14 }
 0x12c   : > { %v862_v17 = vpop.f32.mrf.mxu0  ;;  %v882_v18 = vpop.f32.mrf.mxu1 }
 0x12d   : > { %v378_v19 = vmul.f32 0.25, %v373_v16 }
 0x12e   : > { %v335_v20 = vpop.f32.mrf.mxu0  ;;  %v375_v21 = vpop.f32.mrf.mxu1 }
 0x12f   : > { %v379_v22 = vpack.c.bf16 %v378_v19, %v378_v19 }
 0x130   : > { %v863_v23 = vpop.f32.mrf.mxu0  ;;  %v883_v24 = vpop.f32.mrf.mxu1 }
 0x131   : > { %v380_v25 = vunpack.c.l.bf16 %v379_v22  ;;  %921 = vmatmul.mubr.bf16.vlgmr.msra.gmra.mxu1 %v379_v22 }
 0x132   : > { %945 = vmatpush3.bf16.msra.mxu1 %v1358_v1  ;;  %960 = vmatprep.mubr.msk.bf16.mxu1 %vm1204_vm0, %v1203_v0 }
 0x133   : > { %v381_v26 = vsub.f32 %v378_v19, %v380_v25  ;;  %946 = vmatprep.subr.bf16.mxu1 %v1203_v0 }
 0x135   : > { %v382_v27 = vpack.c.bf16 %v381_v26, %v381_v26 }
 0x136   : > { %947 = vmatpush3.bf16.msra.mxu1 %v1362_v2 }
 0x137   : > { %901 = vmatmul.mubr.bf16.vlgmr.msra.gmra.mxu0 %v382_v27  ;;  %948 = vmatprep.subr.bf16.mxu1 %v1203_v0 }
 0x138   : > { %925 = vmatpush3.bf16.msra.mxu0 %v1358_v1  ;;  %940 = vmatprep.mubr.msk.bf16.mxu0 %vm1204_vm0, %v1203_v0 }
 0x139   : > { %926 = vmatprep.subr.bf16.mxu0 %v1203_v0 }
 0x13a   : > { %949 = vmatpush3.bf16.msra.mxu1 %v1368_v3 }
 0x13b   : > { %950 = vmatprep.subr.bf16.mxu1 %v1203_v0 }
 0x13c   : > { %927 = vmatpush3.bf16.msra.mxu0 %v1362_v2 }
 0x13d   : > { %928 = vmatprep.subr.bf16.mxu0 %v1203_v0 }
 0x13e   : > { %951 = vmatpush3.bf16.msra.mxu1 %v1374_v4 }
 0x13f   : > { %952 = vmatprep.subr.bf16.mxu1 %v1203_v0 }
 0x140   : > { %929 = vmatpush3.bf16.msra.mxu0 %v1368_v3 }
 0x141   : > { %930 = vmatprep.subr.bf16.mxu0 %v1203_v0 }
 0x142   : > { %953 = vmatpush3.bf16.msra.mxu1 %v1380_v5 }
 0x143   : > { %954 = vmatprep.subr.bf16.mxu1 %v1203_v0 }
 0x144   : > { %931 = vmatpush3.bf16.msra.mxu0 %v1374_v4 }
 0x145   : > { %932 = vmatprep.subr.bf16.mxu0 %v1203_v0 }
 0x146   : > { %955 = vmatpush3.bf16.msra.mxu1 %v1390_v8 }
 0x147   : > { %956 = vmatprep.subr.bf16.mxu1 %v1203_v0 }
 0x148   : > { %933 = vmatpush3.bf16.msra.mxu0 %v1380_v5 }
 0x149   : > { %934 = vmatprep.subr.bf16.mxu0 %v1203_v0 }
 0x14a   : > { %957 = vmatpush3.bf16.msra.mxu1 %v1396_v10 }
 0x14b   : > { %958 = vmatprep.subr.bf16.mxu1 %v1203_v0 }
 0x14c   : > { %935 = vmatpush3.bf16.msra.mxu0 %v1390_v8 }
 0x14d   : > { %936 = vmatprep.subr.bf16.mxu0 %v1203_v0 }
 0x14e   : > { %959 = vmatpush3.bf16.msra.mxu1 %v1403_v12 }
 0x14f   : > { %984 = vmatprep.subr.bf16.mxu1 %v1203_v0 }
 0x150   : > { %937 = vmatpush3.bf16.msra.mxu0 %v1396_v10 }
 0x151   : > { %938 = vmatprep.subr.bf16.mxu0 %v1203_v0 }
 0x154   : > { %939 = vmatpush3.bf16.msra.mxu0 %v1403_v12 }
 0x155   : > { %964 = vmatprep.subr.bf16.mxu0 %v1203_v0 }
 0x1f1   : > { %v457_v28 = vpop.f32.mrf.mxu1 }
 0x1f3   : > { %v922_v29 = vpop.f32.mrf.mxu1 }
 0x1f5   : > { %v460_v30 = vpop.f32.mrf.mxu1 }
 0x1f7   : > { %v417_v31 = vpop.f32.mrf.mxu0  ;;  %v923_v32 = vpop.f32.mrf.mxu1 }
 0x1f8   : > { %v458_v33 = vadd.f32 %v457_v28, %v417_v31 }
 0x1f9   : > { %v902_v34 = vpop.f32.mrf.mxu0 }
 0x1fa   : > { %v1484_v35 = vsub.f32 %v1382_v6, %v458_v33 }
 0x1fb   : > { %v420_v36 = vpop.f32.mrf.mxu0 }
 0x1fc   : > { %v464_v37 = vmul.f32 %v1484_v35, %v1484_v35 }
 0x1fd   : > { %v903_v38 = vpop.f32.mrf.mxu0 }
 0x1fe   : > { %v465_v39 = vpack.c.bf16 %v464_v37, %v464_v37 }
 0x200   : > { %v466_v40 = vunpack.c.l.bf16 %v465_v39  ;;  %961 = vmatmul.mubr.bf16.vlgmr.msra.gmra.mxu1 %v465_v39 }
 0x201   : > { %985 = vmatpush3.bf16.xpose.msra.mxu1 %v1358_v1  ;;  %1000 = vmatprep.mubr.msk.bf16.mxu1 %vm1204_vm0, %v1203_v0 }
 0x202   : > { %v467_v41 = vsub.f32 %v464_v37, %v466_v40  ;;  %986 = vmatprep.subr.bf16.mxu1 %v1203_v0 }
 0x204   : > { %v468_v42 = vpack.c.bf16 %v467_v41, %v467_v41 }
 0x206   : > { %941 = vmatmul.mubr.bf16.vlgmr.msra.gmra.mxu0 %v468_v42 }
 0x207   : > { %965 = vmatpush3.bf16.xpose.msra.mxu0 %v1358_v1  ;;  %980 = vmatprep.mubr.msk.bf16.mxu0 %vm1204_vm0, %v1203_v0 }
 0x208   : > { %966 = vmatprep.subr.bf16.mxu0 %v1203_v0 }
 0x209   : > { %987 = vmatpush3.bf16.xpose.msra.mxu1 %v1362_v2 }
 0x20a   : > { %988 = vmatprep.subr.bf16.mxu1 %v1203_v0 }
 0x20f   : > { %967 = vmatpush3.bf16.xpose.msra.mxu0 %v1362_v2 }
 0x210   : > { %968 = vmatprep.subr.bf16.mxu0 %v1203_v0 }
 0x211   : > { %989 = vmatpush3.bf16.xpose.msra.mxu1 %v1368_v3 }
 0x212   : > { %990 = vmatprep.subr.bf16.mxu1 %v1203_v0 }
 0x217   : > { %969 = vmatpush3.bf16.xpose.msra.mxu0 %v1368_v3 }
 0x218   : > { %970 = vmatprep.subr.bf16.mxu0 %v1203_v0 }
 0x219   : > { %991 = vmatpush3.bf16.xpose.msra.mxu1 %v1374_v4 }
 0x21a   : > { %992 = vmatprep.subr.bf16.mxu1 %v1203_v0 }
 0x21f   : > { %971 = vmatpush3.bf16.xpose.msra.mxu0 %v1374_v4  ;;  %v767_v4 = vld [vmem:[%s1568_s2] ss:$0 sm:$0xff] }
 0x220   : > { %972 = vmatprep.subr.bf16.mxu0 %v1203_v0 }
 0x221   : > { %993 = vmatpush3.bf16.xpose.msra.mxu1 %v1380_v5 }
 0x222   : > { %994 = vmatprep.subr.bf16.mxu1 %v1203_v0 }
 0x227   : > { %973 = vmatpush3.bf16.xpose.msra.mxu0 %v1380_v5 }
 0x228   : > { %974 = vmatprep.subr.bf16.mxu0 %v1203_v0 }
 0x229   : > { %995 = vmatpush3.bf16.xpose.msra.mxu1 %v1390_v8 }
 0x22a   : > { %996 = vmatprep.subr.bf16.mxu1 %v1203_v0 }
 0x22f   : > { %975 = vmatpush3.bf16.xpose.msra.mxu0 %v1390_v8 }
 0x230   : > { %976 = vmatprep.subr.bf16.mxu0 %v1203_v0 }
 0x231   : > { %997 = vmatpush3.bf16.xpose.msra.mxu1 %v1396_v10 }
 0x232   : > { %998 = vmatprep.subr.bf16.mxu1 %v1203_v0 }
 0x237   : > { %977 = vmatpush3.bf16.xpose.msra.mxu0 %v1396_v10 }
 0x238   : > { %978 = vmatprep.subr.bf16.mxu0 %v1203_v0 }
 0x239   : > { %999 = vmatpush3.bf16.xpose.msra.mxu1 %v1403_v12 }
 0x23f   : > { %979 = vmatpush3.bf16.xpose.msra.mxu0 %v1403_v12 }
 0x2c0   : > { %v543_v43 = vpop.f32.mrf.mxu1 }
 0x2c2   : > { %v962_v44 = vpop.f32.mrf.mxu1 }
 0x2c4   : > { %v546_v45 = vpop.f32.mrf.mxu1 }
 0x2c6   : > { %v503_v46 = vpop.f32.mrf.mxu0  ;;  %v963_v47 = vpop.f32.mrf.mxu1 }
 0x2c7   : > { %v544_v48 = vadd.f32 %v543_v43, %v503_v46 }
 0x2c8   : > { %v942_v49 = vpop.f32.mrf.mxu0 }
 0x2c9   : > { %v549_v50 = vmul.f32 0.25, %v544_v48 }
 0x2ca   : > { %v506_v51 = vpop.f32.mrf.mxu0 }
 0x2cb   : > { %v550_v52 = vadd.f32 1e-05, %v549_v50 }
 0x2cc   : > { %v943_v53 = vpop.f32.mrf.mxu0 }
 0x2cd   : > { %1073 = vrsqrt.f32 %v550_v52 }
 0x2da   : > { %v1074_v54 = vpop.eup %1073 }
 0x2db   : > { %v552_v55 = vpack.c.bf16 %v1074_v54, %v1074_v54 }
 0x2dd   : > { %v553_v56 = vunpack.c.l.bf16 %v552_v55  ;;  %1001 = vmatmul.mubr.bf16.vlgmr.msra.gmra.mxu1 %v552_v55 }
 0x2df   : > { %v554_v57 = vsub.f32 %v1074_v54, %v553_v56 }
 0x2e1   : > { %v555_v58 = vpack.c.bf16 %v554_v57, %v554_v57 }
 0x2e3   : > { %981 = vmatmul.mubr.bf16.vlgmr.msra.gmra.mxu0 %v555_v58 }
 0x39d   : > { %v630_v59 = vpop.f32.mrf.mxu1 }
 0x39f   : > { %v1002_v60 = vpop.f32.mrf.mxu1 }
 0x3a1   : > { %v633_v61 = vpop.f32.mrf.mxu1 }
 0x3a3   : > { %v590_v62 = vpop.f32.mrf.mxu0  ;;  %v1003_v0 = vpop.f32.mrf.mxu1 }
 0x3a4   : > { %v631_v1 = vadd.f32 %v630_v59, %v590_v62 }
 0x3a5   : > { %v982_v2 = vpop.f32.mrf.mxu0 }
 0x3a6   : > { %v643_v3 = vmul.f32 %v766_v63, %v631_v1 }
 0x3a7   : > { %v593_v5 = vpop.f32.mrf.mxu0 }
 0x3a8   : > { %v644_v6 = vmul.f32 %v643_v3, %v1484_v35 }
 0x3a9   : > { %v983_v7 = vpop.f32.mrf.mxu0 }
 0x3aa   : > { %v652_v8 = vadd.f32 %v767_v4, %v644_v6 }
 0x3ac   : > { %653 = vst [vmem:[%s227_s29] sm:$0xff] %v652_v8 }
 0x3ad   : > { %1142 = shalt.err (!%p1139_p0)
}
 0x3ae   : > { %s1143_s5 = scalar_lea.hbm %s666_s13, 128  ;;  %s1147_s21 = scalar_lea.hbm %s1570_s4, 256 }
 0x3af   : > { %p1144_p5 = scmp.ne.s32.totalorder %s666_s13, %s1143_s5  ;;  %p1148_p1 = scmp.lt.s32.totalorder %s666_s13, %s1570_s4 }
 0x3b0   : > { %p1149_p4 = scmp.lt.s32.totalorder %s1147_s21, %s1143_s5 }
 0x3b1   : > { %p1145_p9 = pnand %p1144_p5, %p1586_p3 }
 0x3b2   : > { %p1150_p6 = por %p1149_p4, %p1148_p1 }
 0x3b3   : > { %p1146_p12 = pneg %p1145_p9 }
 0x3b5   : > { %p1151_p8 = pnand %p1150_p6, %p1146_p12 }
 0x3b7   : > { %1154 = shalt.err (!%p1151_p8)
}
 0x3b8   : > { %1010 = dma.vmem_to_hbm [thread:$0]  (%p1586_p3), %s669_s7, 128, %s666_s13, %s655_s11  }
 0x3b9 PF: > { %s680_s26 = sand.u32 1, %s1185_s15   ;;  %p1587_p11 = scmp.ne.s32.totalorder %s1576_s22, 0 }
 0x3ba   : > { %p1588_p7 = scmp.ge.s32.totalorder %s1197_s18, 2  ;;  %s681_s28 = scalar_lea.sflag [#allocation4], %s680_s26 }
 0x3bc   : > { %p1021_p10 = pnand %p1588_p7, %p1587_p11 }
 0x3be   : > { %p1022_p2 = pneg %p1021_p10 }
 0x3c0   : > { %1180 = dma.done.wait (%p1022_p2), %s681_s28, 128  }
 0x3c1   : > { %1182 = vsyncadd (%p1022_p2), %s681_s28, 4294967168  ;;  %p18_p13 = scmp.ge.s32.totalorder %s1285_s27, 4   ;;  %s1589_s15 = smov %s1189_s16 }
 0x3c2   : > { %s1590_s16 = smov %s1193_s17  ;;  %s1591_s17 = smov %s1302_s9 }
 0x3c3   : > { %s1592_s18 = smov %s1285_s27  ;;  %20 = sbr.rel (!%p18_p13) target bundleno = 6 (0x6), region = 85 }
 0x3c8   :  { %686 = vsyncpa [#allocation3], 1 }
 0x3c9   :  { %688 = vsyncpa [#allocation3 + $0x1], 1 }
 0x3ca   :  { %689 = vsyncpa [#allocation6], 1 }
 0x3cb   :  { %690 = vsyncpa [#allocation4], 1 }
 0x3cc   :  { %692 = vsyncpa [#allocation4 + $0x1], 1 }

</bundles_post_ra>
